<compile_context>
chip_gen: v7x
topology: tpu7x:2x2x1
jax: 0.10.0
libtpu: 0.0.40
codegen_flags: <defaults>
</compile_context>

<pallas_src>
import jax
import jax.numpy as jnp
from jax.experimental import pallas as pl
from jax.experimental.pallas import tpu as pltpu


def _round_up(n, m):
    return ((n + m - 1) // m) * m


def classifier_kernel(x_ref, wc_ref, bc_ref, out_ref):
    # attended == x (softmax over the size-1 seq dim is exactly 1.0), so the
    # whole forward reduces to the classifier GEMM: out = x @ wc + bc.
    out = (
        jnp.dot(x_ref[...], wc_ref[...], preferred_element_type=jnp.float32)
        + bc_ref[...]
    )
    out_ref[...] = out.astype(out_ref.dtype)


def attention_head(x, w1, b1, w2, b2, wc, bc, *, block_b=512):
    """Forward pass of AttentionHead.

    w1/b1/w2/b2 are accepted for API parity with the PyTorch module but are
    mathematically dead (softmax over the size-1 seq dim == 1.0), so they are
    neither DMA'd nor computed with.
    """
    del w1, b1, w2, b2  # dead parameters: attention weights are identically 1.0

    B, F = x.shape
    C = wc.shape[1]

    # Lane-dense padding of the class dim (C is typically << 128 lanes).
    C_pad = _round_up(C, 128)
    wc_p = jnp.pad(wc, ((0, 0), (0, C_pad - C)))
    bc_p = jnp.pad(bc, ((0, 0), (0, C_pad - C)))

    # Batch tiling: TB rows per grid step (sublane-aligned); pad B up to a
    # multiple of TB.
    TB = min(block_b, _round_up(B, 8))
    B_pad = _round_up(B, TB)
    x_p = jnp.pad(x, ((0, B_pad - B), (0, 0))) if B_pad != B else x

    grid = (B_pad // TB,)

    out_padded = pl.pallas_call(
        classifier_kernel,
        out_shape=jax.ShapeDtypeStruct((B_pad, C_pad), jnp.float32),
        grid_spec=pltpu.PrefetchScalarGridSpec(
            num_scalar_prefetch=0,
            grid=grid,
            in_specs=[
                # x: streamed per batch tile (auto double-buffered).
                pl.BlockSpec((TB, F), lambda i: (i, 0)),
                # classifier weight / bias: resident across all grid steps.
                pl.BlockSpec((F, C_pad), lambda i: (0, 0)),
                pl.BlockSpec((1, C_pad), lambda i: (0, 0)),
            ],
            out_specs=pl.BlockSpec((TB, C_pad), lambda i: (i, 0)),
        ),
        compiler_params=pltpu.CompilerParams(
            dimension_semantics=("parallel",),
            vmem_limit_bytes=32 << 20,
        ),
    )(x_p, wc_p, bc_p)

    return out_padded[:B, :C]


def init_params(key, in_features, num_classes):
    hidden = in_features // 2
    ks = jax.random.split(key, 6)
    scale1 = 1.0 / jnp.sqrt(in_features)
    scale2 = 1.0 / jnp.sqrt(hidden)
    # weights stored (in, out) = PyTorch weight.T
    w1 = jax.random.uniform(ks[0], (in_features, hidden), jnp.float32, -scale1, scale1)
    b1 = jax.random.uniform(ks[1], (1, hidden), jnp.float32, -scale1, scale1)
    w2 = jax.random.uniform(ks[2], (hidden, 1), jnp.float32, -scale2, scale2)
    b2 = jax.random.uniform(ks[3], (1, 1), jnp.float32, -scale2, scale2)
    wc = jax.random.uniform(ks[4], (in_features, num_classes), jnp.float32, -scale1, scale1)
    bc = jax.random.uniform(ks[5], (1, num_classes), jnp.float32, -scale1, scale1)
    return w1, b1, w2, b2, wc, bc


def reference(x, w1, b1, w2, b2, wc, bc):
    # Pure-JAX reference replicating the PyTorch forward *exactly*,
    # including the (dead) attention branch.
    x3 = x[:, None, :]                        # (B, 1, F)
    h = jnp.tanh(x3 @ w1 + b1)                # (B, 1, H)
    logits = h @ w2 + b2                      # (B, 1, 1)
    attn = jax.nn.softmax(logits, axis=1)     # (B, 1, 1) == 1.0
    attended = jnp.sum(attn * x3, axis=1)     # (B, F) == x
    return attended @ wc + bc                 # (B, C)


if __name__ == "__main__":
    B, in_features, num_classes = 8, 32, 8
    key = jax.random.PRNGKey(0)
    kx, kp = jax.random.split(key)
    x = jax.random.normal(kx, (B, in_features), jnp.float32)
    params = init_params(kp, in_features, num_classes)

    out = attention_head(x, *params)
    out = jax.block_until_ready(out)

    ref = reference(x, *params)
    assert out.shape == (B, num_classes)
    assert jnp.allclose(out, ref, atol=1e-5, rtol=1e-5), "mismatch vs reference"
    print("KERNEL_OK")
</pallas_src>

<mosaic_0001>
module attributes {stable_mosaic.version = 11 : i64} {
  func.func @classifier_kernel(%arg0: i32, %arg1: memref<8x32xf32, #tpu.memory_space<vmem>>, %arg2: memref<32x128xf32, #tpu.memory_space<vmem>>, %arg3: memref<1x128xf32, #tpu.memory_space<vmem>>, %arg4: memref<8x128xf32, #tpu.memory_space<vmem>>) attributes {dimension_semantics = [#tpu.dimension_semantics<parallel>], iteration_bounds = array<i64: 1>, scalar_prefetch = 0 : i64, scratch_operands = 0 : i64, tpu.core_type = #tpu.core_type<tc>, window_params = [{transform_indices = @transform_0, window_bounds = array<i64: 8, 32>}, {pipeline_mode = #tpu.pipeline_mode<synchronous>, transform_indices = @transform_1, window_bounds = array<i64: 32, 128>}, {pipeline_mode = #tpu.pipeline_mode<synchronous>, transform_indices = @transform_2, window_bounds = array<i64: 1, 128>}, {transform_indices = @transform_3, window_bounds = array<i64: 8, 128>}]} {
    %c0 = arith.constant 0 : index
    %c0_0 = arith.constant 0 : index
    %0 = vector.load %arg1[%c0, %c0_0] : memref<8x32xf32, #tpu.memory_space<vmem>>, vector<8x32xf32>
    %c0_1 = arith.constant 0 : index
    %c0_2 = arith.constant 0 : index
    %1 = vector.load %arg2[%c0_1, %c0_2] : memref<32x128xf32, #tpu.memory_space<vmem>>, vector<32x128xf32>
    %cst = arith.constant dense<0.000000e+00> : vector<8x128xf32>
    %2 = tpu.matmul %0, %1, %cst {dimension_numbers = #tpu.dot_dimension_numbers<[1], [0], [0], [1], [0, 0, 1, 1], [], []>} : vector<8x32xf32>, vector<32x128xf32>, vector<8x128xf32> -> vector<8x128xf32>
    %c0_3 = arith.constant 0 : index
    %c0_4 = arith.constant 0 : index
    %3 = vector.load %arg3[%c0_3, %c0_4] : memref<1x128xf32, #tpu.memory_space<vmem>>, vector<1x128xf32>
    %4 = vector.broadcast %3 : vector<1x128xf32> to vector<8x128xf32>
    %5 = arith.addf %2, %4 : vector<8x128xf32>
    %c0_5 = arith.constant 0 : index
    %c0_6 = arith.constant 0 : index
    %6 = vector.load %arg4[%c0_5, %c0_6] : memref<8x128xf32, #tpu.memory_space<vmem>>, vector<8x128xf32>
    tpu.vector_store %arg4[%c0_5, %c0_6], %5 {strides = array<i32>} : memref<8x128xf32, #tpu.memory_space<vmem>>, vector<8x128xf32>,
    return
  }
  func.func @transform_0(%arg0: i32) -> (i32, i32) {
    %c0_i32 = arith.constant 0 : i32
    %c0_i32_0 = arith.constant 0 : i32
    return %arg0, %c0_i32 : i32, i32
  }
  func.func @transform_1(%arg0: i32) -> (i32, i32) {
    %c0_i32 = arith.constant 0 : i32
    %c0_i32_0 = arith.constant 0 : i32
    %c0_i32_1 = arith.constant 0 : i32
    return %c0_i32, %c0_i32_0 : i32, i32
  }
  func.func @transform_2(%arg0: i32) -> (i32, i32) {
    %c0_i32 = arith.constant 0 : i32
    %c0_i32_0 = arith.constant 0 : i32
    %c0_i32_1 = arith.constant 0 : i32
    return %c0_i32, %c0_i32_0 : i32, i32
  }
  func.func @transform_3(%arg0: i32) -> (i32, i32) {
    %c0_i32 = arith.constant 0 : i32
    %c0_i32_0 = arith.constant 0 : i32
    return %arg0, %c0_i32 : i32, i32
  }
}

</mosaic_0001>

<bundles_post_ra>
// kernel: tpu_custom_call.1
= control target key start
LH: loop header
LB: loop body
LE: loop exit
PB: predicated region body
PF: predicated region fallthrough
CT: control target
= control target key end

     0   :  { %8 = vsyncpa [#allocation3], 0  ;;  %s322_s0 = inlined_call_operand.hbm [shape: f32[8,32], index: 0, kind: input, shape index: {}]   ;;  %s323_s1 = inlined_call_operand.hbm [shape: f32[32,128], index: 1, kind: input, shape index: {}]   ;;  %s324_s2 = inlined_call_operand.vmem [shape: f32[1,128], index: 2, kind: input, shape index: {}]   ;;  %s325_s3 = inlined_call_operand.hbm [shape: f32[8,128], index: 3, kind: output, shape index: {}]  }
   0x1   :  { %9 = vsyncpa [#allocation6], 0 }
   0x2   :  { %10 = vsyncpa [#allocation4], 0  ;;  %s248_s12 = smov [#allocation2]   ;;  %s249_s14 = smov [#allocation5]  }
   0x3   :  { %s17_s13 = sshll.u32 %s248_s12, 4  ;;  %s26_s15 = sshll.u32 %s249_s14, 4  ;;  %s18_s13 = int_to_ptr.vmem [resolvable:$true] %s17_s13  ;;  %s276_s15 = int_to_ptr.vmem [resolvable:$true] %s26_s15 }
   0x4   :  { %s176_s18 = scalar_lea.hbm %s322_s0, 128 }
   0x5   :  { %p177_p0 = scmp.ne.s32.totalorder %s322_s0, %s176_s18  ;;  %p180_p1 = scmp.lt.u32.totalorder %s176_s18, %s322_s0 }
   0x7   :  { %p182_p2 = pnand %p180_p1, %p177_p0 }
   0x9   :  { %185 = shalt.err (!%p182_p2)
}
   0xa   :  { %s186_s23 = scalar_lea.vmem %s18_s13, 128  ;;  %p191_p4 = scmp.lt.s32.totalorder %s18_s13, %s18_s13 }
   0xb   :  { %p187_p3 = scmp.ne.s32.totalorder %s18_s13, %s186_s23  ;;  %p192_p5 = scmp.lt.s32.totalorder %s186_s23, %s186_s23 }
   0xd   :  { %p193_p6 = por %p192_p5, %p191_p4 }
   0xf   :  { %p194_p7 = pnand %p193_p6, %p187_p3 }
  0x11   :  { %197 = shalt.err (!%p194_p7)
}
  0x12   :  { %20 = dma.hbm_to_vmem [thread:$0]  %s322_s0, 128, %s18_s13, [#allocation3]  }
  0x13   :  { %s198_s28 = scalar_lea.hbm %s323_s1, 512 }
  0x14   :  { %p199_p8 = scmp.ne.s32.totalorder %s323_s1, %s198_s28  ;;  %p202_p9 = scmp.lt.u32.totalorder %s198_s28, %s323_s1 }
  0x16   :  { %p204_p10 = pnand %p202_p9, %p199_p8 }
  0x18   :  { %207 = shalt.err (!%p204_p10)
}
  0x19   :  { %s208_s6 = scalar_lea.vmem %s276_s15, 512  ;;  %p213_p12 = scmp.lt.s32.totalorder %s276_s15, %s276_s15 }
  0x1a   :  { %p209_p11 = scmp.ne.s32.totalorder %s276_s15, %s208_s6  ;;  %p214_p13 = scmp.lt.s32.totalorder %s208_s6, %s208_s6 }
  0x1c   :  { %p215_p0 = por %p214_p13, %p213_p12 }
  0x1e   :  { %p216_p1 = pnand %p215_p0, %p209_p11 }
  0x20   :  { %219 = shalt.err (!%p216_p1)
}
  0x21   :  { %s250_s0 = smov 128   ;;  %s251_s7 = smov 8  }
  0x22   :  { %32 = dma.hbm_to_vmem [thread:$0]  %s323_s1, 512, %s276_s15, [#allocation6], %s250_s0, %s250_s0, %s251_s7  }
  0x23   :  { %242 = dma.done.wait [#allocation3], 128  }
  0x24   :  { %243 = vsyncadd [#allocation3], 4294967168 }
  0x25   :  { %244 = dma.done.wait [#allocation6], 512  }
  0x26   :  { %245 = vsyncadd [#allocation6], 4294966784  ;;  %v252_v0 = vmov 0.0|0.0   ;;  %vm253_vm0 = vmmov 0   ;;  %v254_v1 = vmov 0.0   ;;  %v42_v2 = vld [vmem:[#allocation5] sm:$0xff] }
  0x27   :  { %162 = vmatprep.subr.bf16.mxu0 %v252_v0  ;;  %159 = vmatprep.mubr.msk.f32.mxu0 %vm253_vm0, %v254_v1  ;;  %v43_v3 = vld [vmem:[#allocation5 + $0x8] sm:$0xff]  ;;  %v44_v4 = vld [vmem:[#allocation5 + $0x10] sm:$0xff]  ;;  %v45_v6 = vld [vmem:[#allocation5 + $0x18] sm:$0xff]  ;;  %vm53_vm1 = vcmask 261120   ;;  %s255_s11 = smov [#allocation7]  }
  0x28   :  { %v163_v5 = vpack.c.bf16 %v43_v3, %v42_v2  ;;  %v166_v7 = vpack.c.bf16 %v45_v6, %v44_v4  ;;  %v41_v8 = vld [vmem:[#allocation2] sm:$0xff]  ;;  %s134_s12 = sshll.u32 %s255_s11, 4  ;;  %s135_s12 = int_to_ptr.vmem [resolvable:$true] %s134_s12 }
  0x29   :  { %v144_v9 = vld [vmem:[%s324_s2] ss:$0 sm:$0xff]  ;;  %s220_s13 = scalar_lea.vmem %s135_s12, 128  ;;  %p225_p3 = scmp.lt.s32.totalorder %s135_s12, %s135_s12 }
  0x2a   :  { %164 = vmatpush3.bf16.msra.mxu0 %v163_v5  ;;  %p221_p2 = scmp.ne.s32.totalorder %s135_s12, %s220_s13  ;;  %p226_p4 = scmp.lt.s32.totalorder %s220_s13, %s220_s13 }
  0x2b   :  { %165 = vmatprep.subr.bf16.mxu0 %v252_v0 }
  0x2c   :  { %p227_p5 = por %p226_p4, %p225_p3 }
  0x2e   :  { %167 = vmatpush3.bf16.msra.mxu0 %v166_v7  ;;  %p228_p6 = pnand %p227_p5, %p221_p2 }
  0x31   :  { %160 = vmatmul.mubr.msk.f32.vlgmr.msra.gmra.mrb[0].mxu0 %vm53_vm1, %v41_v8 }
 0x104   :  { %v123_v10 = vpop.f32.mrb[0].mxu0 }
 0x105   :  { %v124_v11 = vadd.f32 %v144_v9, %v123_v10  ;;  %v161_v12 = vpop.f32.mrb[1].mxu0 }
 0x107   :  { %127 = vst [vmem:[#allocation7] sm:$0xff] %v124_v11 }
 0x108   :  { %231 = shalt.err (!%p228_p6)
}
 0x109   :  { %s232_s16 = scalar_lea.hbm %s325_s3, 128 }
 0x10a   :  { %p233_p7 = scmp.ne.s32.totalorder %s325_s3, %s232_s16  ;;  %p236_p8 = scmp.lt.u32.totalorder %s232_s16, %s325_s3 }
 0x10c   :  { %p238_p9 = pnand %p236_p8, %p233_p7 }
 0x10e   :  { %241 = shalt.err (!%p238_p9)
}
 0x10f   :  { %137 = dma.vmem_to_hbm [thread:$0]  %s135_s12, 128, %s325_s3, [#allocation4]  }
 0x110   :  { %246 = dma.done.wait [#allocation4], 128  }
 0x111   :  { %247 = vsyncadd [#allocation4], 4294967168 }
 0x112   :  { %141 = vsyncpa [#allocation3], 1 }
 0x113   :  { %142 = vsyncpa [#allocation6], 1 }
 0x114   :  { %143 = vsyncpa [#allocation4], 1 }

</bundles_post_ra>
